<compile_context>
chip_gen: v5e
topology: v5e:2x2
jax: 0.10.0
libtpu: 0.0.40
codegen_flags: <defaults>
</compile_context>

<pallas_src>
import functools

import jax
import jax.numpy as jnp
from jax.experimental import pallas as pl
from jax.experimental.pallas import tpu as pltpu


def _round_up(x, m):
    return ((x + m - 1) // m) * m


def _focal_kernel(x_ref, t_ref, o_ref, *, coefs, gamma, num_classes):
    # x_ref: (1, C, bhw) logits, t_ref: (1, 1, bhw) int32, o_ref: (1, 1, bhw) f32
    x = x_ref[0].astype(jnp.float32)          # (C, bhw), cast in-kernel (bf16 ok)
    t = t_ref[0]                              # (1, bhw) int32
    C = num_classes

    # Running max over classes (unrolled; lane-dense VALU ops).
    m = x[0:1, :]
    for c in range(1, C):
        m = jnp.maximum(m, x[c:c + 1, :])

    # Softmax denominator + gather of the target-class terms in one pass.
    s = jnp.zeros_like(m)
    z_t = jnp.zeros_like(m)                   # shifted logit of target class
    e_t = jnp.zeros_like(m)                   # exp(shifted logit) of target class
    coef_t = jnp.zeros_like(m)                # -alpha * class_alpha[target]
    for c in range(C):
        z_c = x[c:c + 1, :] - m
        e_c = jnp.exp(z_c)
        s = s + e_c
        sel = (t == c)
        z_t = jnp.where(sel, z_c, z_t)
        e_t = jnp.where(sel, e_c, e_t)
        coef_t = jnp.where(sel, coefs[c], coef_t)   # coefs are Python floats

    inv_s = pl.reciprocal(s, approx=False)
    p_t = e_t * inv_s                         # softmax probability of target class
    log_p_t = z_t - jnp.log(s)                # log_softmax at target class

    one_minus = 1.0 - p_t
    g = float(gamma)
    if g == float(int(g)) and 0 <= int(g) <= 8:
        gi = int(g)
        w = jnp.ones_like(one_minus) if gi == 0 else one_minus
        for _ in range(gi - 1):
            w = w * one_minus                 # integer gamma: no pow (no EUP log+exp)
    else:
        w = jnp.power(one_minus, g)           # general gamma, target class only

    o_ref[0] = (coef_t * w * log_p_t).astype(o_ref.dtype)


def focal_loss_pallas(logits, target, *, alpha, gamma=2.0, reduction="none",
                      alphas=(0.05, 0.15, 0.8, 0.8, 0.15), block_hw=8192):
    """logits: (B, C, H, W) float (f32 or bf16), target: (B, H, W) int."""
    B, C, H, W = logits.shape
    assert target.shape == (B, H, W)
    HW = H * W

    # Fold -alpha and the per-class alphas into one per-class coefficient
    # (PyTorch only scales the first len(alphas) channels, and only if
    # int(alphas[0]) != 1).  These stay Python floats -> no captured constants.
    class_alphas = [1.0] * C
    if int(alphas[0]) != 1:
        for i in range(min(len(alphas), C)):
            class_alphas[i] = float(alphas[i])
    coefs = tuple(-float(alpha) * a for a in class_alphas)

    # Lane-dense pixel table: (B, C, HW) -- no transpose, reshape is free.
    hw_pad128 = _round_up(HW, 128)
    block = min(int(block_hw), hw_pad128)
    block = _round_up(block, 128)
    HW_pad = _round_up(HW, block)

    x3 = logits.reshape(B, C, HW)
    t3 = target.reshape(B, 1, HW).astype(jnp.int32)
    if HW_pad != HW:
        x3 = jnp.pad(x3, ((0, 0), (0, 0), (0, HW_pad - HW)))
        t3 = jnp.pad(t3, ((0, 0), (0, 0), (0, HW_pad - HW)))

    grid = (B, HW_pad // block)

    kernel = functools.partial(_focal_kernel, coefs=coefs, gamma=float(gamma),
                               num_classes=C)

    loss3 = pl.pallas_call(
        kernel,
        out_shape=jax.ShapeDtypeStruct((B, 1, HW_pad), jnp.float32),
        grid=grid,
        in_specs=[
            pl.BlockSpec((1, C, block), lambda b, j: (b, 0, j)),
            pl.BlockSpec((1, 1, block), lambda b, j: (b, 0, j)),
        ],
        out_specs=pl.BlockSpec((1, 1, block), lambda b, j: (b, 0, j)),
        compiler_params=pltpu.CompilerParams(
            dimension_semantics=("parallel", "parallel")),
    )(x3, t3)

    loss_tmp = loss3[:, 0, :HW].reshape(B, H, W)
    # TODO(synk): for reduction="mean"/"sum" fuse the reduction into the kernel
    # (SMEM accumulator + pl.when on last grid step) to skip the extra HBM pass.
    if reduction == "none":
        return loss_tmp
    elif reduction == "mean":
        return jnp.mean(loss_tmp)
    elif reduction == "sum":
        return jnp.sum(loss_tmp)
    else:
        raise NotImplementedError(f"Invalid reduction mode: {reduction}")


class FocalLoss:
    def __init__(self, config):
        self.alpha = config["alpha"]
        self.gamma = config["gamma"]
        self.reduction = config["reduction"]

    def __call__(self, logits, target):
        return focal_loss_pallas(logits, target, alpha=self.alpha,
                                 gamma=self.gamma, reduction=self.reduction)


def _focal_loss_ref(logits, target, alpha, gamma, reduction,
                    alphas=(0.05, 0.15, 0.8, 0.8, 0.15)):
    # Pure-JAX reference mirroring the PyTorch code (for verification).
    input_soft = jax.nn.softmax(logits, axis=1)
    log_input_soft = jax.nn.log_softmax(logits, axis=1)
    C = logits.shape[1]
    one_hot = jax.nn.one_hot(target, C, axis=1, dtype=logits.dtype)
    weight = jnp.power(1.0 - input_soft, gamma)
    focal = -alpha * weight * log_input_soft
    if int(alphas[0]) != 1:
        ca = jnp.array(list(alphas[:C]) + [1.0] * max(0, C - len(alphas)),
                       dtype=logits.dtype)
        focal = focal * ca[None, :, None, None]
    loss_tmp = jnp.einsum("bchw,bchw->bhw", one_hot, focal)
    if reduction == "none":
        return loss_tmp
    if reduction == "mean":
        return jnp.mean(loss_tmp)
    if reduction == "sum":
        return jnp.sum(loss_tmp)
    raise NotImplementedError


if __name__ == "__main__":
    key = jax.random.PRNGKey(0)
    k1, k2 = jax.random.split(key)

    B, C, H, W = 2, 5, 16, 16  # C=5 matches the default per-class alphas list
    logits = jax.random.normal(k1, (B, C, H, W), dtype=jnp.float32)
    target = jax.random.randint(k2, (B, H, W), 0, C, dtype=jnp.int32)

    config = {"alpha": 0.25, "gamma": 2.0, "reduction": "none"}
    module = FocalLoss(config)

    out = module(logits, target)
    out = jax.block_until_ready(out)

    ref = _focal_loss_ref(logits, target, config["alpha"], config["gamma"],
                          config["reduction"])
    assert out.shape == (B, H, W)
    assert jnp.allclose(out, ref, atol=1e-5, rtol=1e-5), "mismatch vs reference"

    # Also sanity-check the fused reductions.
    out_mean = focal_loss_pallas(logits, target, alpha=0.25, gamma=2.0,
                                 reduction="mean")
    ref_mean = _focal_loss_ref(logits, target, 0.25, 2.0, "mean")
    assert jnp.allclose(out_mean, ref_mean, atol=1e-5, rtol=1e-5)

    print("KERNEL_OK")
</pallas_src>

<mosaic_0001>
module attributes {stable_mosaic.version = 11 : i64} {
  func.func @_focal_kernel(%arg0: i32, %arg1: i32, %arg2: memref<1x5x256xf32, #tpu.memory_space<vmem>>, %arg3: memref<1x1x256xi32, #tpu.memory_space<vmem>>, %arg4: memref<1x1x256xf32, #tpu.memory_space<vmem>>) attributes {dimension_semantics = [#tpu.dimension_semantics<parallel>, #tpu.dimension_semantics<parallel>], iteration_bounds = array<i64: 2, 1>, scalar_prefetch = 0 : i64, scratch_operands = 0 : i64, tpu.core_type = #tpu.core_type<tc>, window_params = [{transform_indices = @transform_0, window_bounds = array<i64: 1, 5, 256>}, {transform_indices = @transform_1, window_bounds = array<i64: 1, 1, 256>}, {transform_indices = @transform_2, window_bounds = array<i64: 1, 1, 256>}]} {
    %c0 = arith.constant 0 : index
    %c0_0 = arith.constant 0 : index
    %c0_1 = arith.constant 0 : index
    %0 = vector.load %arg2[%c0, %c0_0, %c0_1] : memref<1x5x256xf32, #tpu.memory_space<vmem>>, vector<1x5x256xf32>
    %1 = vector.shape_cast %0 : vector<1x5x256xf32> to vector<5x256xf32>
    %c0_2 = arith.constant 0 : index
    %c0_3 = arith.constant 0 : index
    %c0_4 = arith.constant 0 : index
    %2 = vector.load %arg3[%c0_2, %c0_3, %c0_4] : memref<1x1x256xi32, #tpu.memory_space<vmem>>, vector<1x1x256xi32>
    %3 = vector.shape_cast %2 : vector<1x1x256xi32> to vector<1x256xi32>
    %4 = vector.extract_strided_slice %1 {offsets = [0, 0], sizes = [1, 256], strides = [1, 1]} : vector<5x256xf32> to vector<1x256xf32>
    %5 = vector.extract_strided_slice %1 {offsets = [1, 0], sizes = [1, 256], strides = [1, 1]} : vector<5x256xf32> to vector<1x256xf32>
    %6 = arith.maximumf %4, %5 : vector<1x256xf32>
    %7 = vector.extract_strided_slice %1 {offsets = [2, 0], sizes = [1, 256], strides = [1, 1]} : vector<5x256xf32> to vector<1x256xf32>
    %8 = arith.maximumf %6, %7 : vector<1x256xf32>
    %9 = vector.extract_strided_slice %1 {offsets = [3, 0], sizes = [1, 256], strides = [1, 1]} : vector<5x256xf32> to vector<1x256xf32>
    %10 = arith.maximumf %8, %9 : vector<1x256xf32>
    %11 = vector.extract_strided_slice %1 {offsets = [4, 0], sizes = [1, 256], strides = [1, 1]} : vector<5x256xf32> to vector<1x256xf32>
    %12 = arith.maximumf %10, %11 : vector<1x256xf32>
    %cst = arith.constant 0.000000e+00 : f32
    %13 = vector.broadcast %cst : f32 to vector<1x256xf32>
    %cst_5 = arith.constant 0.000000e+00 : f32
    %14 = vector.broadcast %cst_5 : f32 to vector<1x256xf32>
    %cst_6 = arith.constant 0.000000e+00 : f32
    %15 = vector.broadcast %cst_6 : f32 to vector<1x256xf32>
    %cst_7 = arith.constant 0.000000e+00 : f32
    %16 = vector.broadcast %cst_7 : f32 to vector<1x256xf32>
    %17 = vector.extract_strided_slice %1 {offsets = [0, 0], sizes = [1, 256], strides = [1, 1]} : vector<5x256xf32> to vector<1x256xf32>
    %18 = arith.subf %17, %12 : vector<1x256xf32>
    %19 = math.exp %18 : vector<1x256xf32>
    %20 = arith.addf %13, %19 : vector<1x256xf32>
    %c0_i32 = arith.constant 0 : i32
    %21 = vector.broadcast %c0_i32 : i32 to vector<1x256xi32>
    %22 = arith.cmpi eq, %3, %21 : vector<1x256xi32>
    %23 = arith.select %22, %18, %14 : vector<1x256xi1>, vector<1x256xf32>
    %24 = arith.select %22, %19, %15 : vector<1x256xi1>, vector<1x256xf32>
    %cst_8 = arith.constant -1.250000e-02 : f32
    %25 = vector.broadcast %cst_8 : f32 to vector<1x256xf32>
    %26 = arith.select %22, %25, %16 : vector<1x256xi1>, vector<1x256xf32>
    %27 = vector.extract_strided_slice %1 {offsets = [1, 0], sizes = [1, 256], strides = [1, 1]} : vector<5x256xf32> to vector<1x256xf32>
    %28 = arith.subf %27, %12 : vector<1x256xf32>
    %29 = math.exp %28 : vector<1x256xf32>
    %30 = arith.addf %20, %29 : vector<1x256xf32>
    %c1_i32 = arith.constant 1 : i32
    %31 = vector.broadcast %c1_i32 : i32 to vector<1x256xi32>
    %32 = arith.cmpi eq, %3, %31 : vector<1x256xi32>
    %33 = arith.select %32, %28, %23 : vector<1x256xi1>, vector<1x256xf32>
    %34 = arith.select %32, %29, %24 : vector<1x256xi1>, vector<1x256xf32>
    %cst_9 = arith.constant -3.750000e-02 : f32
    %35 = vector.broadcast %cst_9 : f32 to vector<1x256xf32>
    %36 = arith.select %32, %35, %26 : vector<1x256xi1>, vector<1x256xf32>
    %37 = vector.extract_strided_slice %1 {offsets = [2, 0], sizes = [1, 256], strides = [1, 1]} : vector<5x256xf32> to vector<1x256xf32>
    %38 = arith.subf %37, %12 : vector<1x256xf32>
    %39 = math.exp %38 : vector<1x256xf32>
    %40 = arith.addf %30, %39 : vector<1x256xf32>
    %c2_i32 = arith.constant 2 : i32
    %41 = vector.broadcast %c2_i32 : i32 to vector<1x256xi32>
    %42 = arith.cmpi eq, %3, %41 : vector<1x256xi32>
    %43 = arith.select %42, %38, %33 : vector<1x256xi1>, vector<1x256xf32>
    %44 = arith.select %42, %39, %34 : vector<1x256xi1>, vector<1x256xf32>
    %cst_10 = arith.constant -2.000000e-01 : f32
    %45 = vector.broadcast %cst_10 : f32 to vector<1x256xf32>
    %46 = arith.select %42, %45, %36 : vector<1x256xi1>, vector<1x256xf32>
    %47 = vector.extract_strided_slice %1 {offsets = [3, 0], sizes = [1, 256], strides = [1, 1]} : vector<5x256xf32> to vector<1x256xf32>
    %48 = arith.subf %47, %12 : vector<1x256xf32>
    %49 = math.exp %48 : vector<1x256xf32>
    %50 = arith.addf %40, %49 : vector<1x256xf32>
    %c3_i32 = arith.constant 3 : i32
    %51 = vector.broadcast %c3_i32 : i32 to vector<1x256xi32>
    %52 = arith.cmpi eq, %3, %51 : vector<1x256xi32>
    %53 = arith.select %52, %48, %43 : vector<1x256xi1>, vector<1x256xf32>
    %54 = arith.select %52, %49, %44 : vector<1x256xi1>, vector<1x256xf32>
    %cst_11 = arith.constant -2.000000e-01 : f32
    %55 = vector.broadcast %cst_11 : f32 to vector<1x256xf32>
    %56 = arith.select %52, %55, %46 : vector<1x256xi1>, vector<1x256xf32>
    %57 = vector.extract_strided_slice %1 {offsets = [4, 0], sizes = [1, 256], strides = [1, 1]} : vector<5x256xf32> to vector<1x256xf32>
    %58 = arith.subf %57, %12 : vector<1x256xf32>
    %59 = math.exp %58 : vector<1x256xf32>
    %60 = arith.addf %50, %59 : vector<1x256xf32>
    %c4_i32 = arith.constant 4 : i32
    %61 = vector.broadcast %c4_i32 : i32 to vector<1x256xi32>
    %62 = arith.cmpi eq, %3, %61 : vector<1x256xi32>
    %63 = arith.select %62, %58, %53 : vector<1x256xi1>, vector<1x256xf32>
    %64 = arith.select %62, %59, %54 : vector<1x256xi1>, vector<1x256xf32>
    %cst_12 = arith.constant -3.750000e-02 : f32
    %65 = vector.broadcast %cst_12 : f32 to vector<1x256xf32>
    %66 = arith.select %62, %65, %56 : vector<1x256xi1>, vector<1x256xf32>
    %67 = tpu.reciprocal %60 : vector<1x256xf32> -> vector<1x256xf32>
    %68 = arith.mulf %64, %67 : vector<1x256xf32>
    %69 = math.log %60 : vector<1x256xf32>
    %70 = arith.subf %63, %69 : vector<1x256xf32>
    %cst_13 = arith.constant 1.000000e+00 : f32
    %71 = vector.broadcast %cst_13 : f32 to vector<1x256xf32>
    %72 = arith.subf %71, %68 : vector<1x256xf32>
    %73 = arith.mulf %72, %72 : vector<1x256xf32>
    %74 = arith.mulf %66, %73 : vector<1x256xf32>
    %75 = arith.mulf %74, %70 : vector<1x256xf32>
    %c0_14 = arith.constant 0 : index
    %c0_15 = arith.constant 0 : index
    %c0_16 = arith.constant 0 : index
    %76 = vector.load %arg4[%c0_14, %c0_15, %c0_16] : memref<1x1x256xf32, #tpu.memory_space<vmem>>, vector<1x1x256xf32>
    %77 = vector.shape_cast %76 : vector<1x1x256xf32> to vector<1x256xf32>
    %78 = vector.shape_cast %75 : vector<1x256xf32> to vector<1x1x256xf32>
    tpu.vector_store %arg4[%c0_14, %c0_15, %c0_16], %78 {strides = array<i32>} : memref<1x1x256xf32, #tpu.memory_space<vmem>>, vector<1x1x256xf32>,
    return
  }
  func.func @transform_0(%arg0: i32, %arg1: i32) -> (i32, i32, i32) {
    %c0_i32 = arith.constant 0 : i32
    %c0_i32_0 = arith.constant 0 : i32
    return %arg0, %c0_i32, %arg1 : i32, i32, i32
  }
  func.func @transform_1(%arg0: i32, %arg1: i32) -> (i32, i32, i32) {
    %c0_i32 = arith.constant 0 : i32
    %c0_i32_0 = arith.constant 0 : i32
    return %arg0, %c0_i32, %arg1 : i32, i32, i32
  }
  func.func @transform_2(%arg0: i32, %arg1: i32) -> (i32, i32, i32) {
    %c0_i32 = arith.constant 0 : i32
    %c0_i32_0 = arith.constant 0 : i32
    return %arg0, %c0_i32, %arg1 : i32, i32, i32
  }
}

</mosaic_0001>

<bundles_post_ra>
// kernel: tpu_custom_call.1
= control target key start
LH: loop header
LB: loop body
LE: loop exit
PB: predicated region body
PF: predicated region fallthrough
CT: control target
= control target key end

     0   :  { %7 = vsyncpa [#allocation3], 0  ;;  %s939_s0 = inlined_call_operand.vmem [shape: f32[2,5,256], index: 0, kind: input, shape index: {}]   ;;  %s940_s1 = inlined_call_operand.vmem [shape: s32[2,1,256], index: 1, kind: input, shape index: {}]   ;;  %s941_s2 = inlined_call_operand.hbm [shape: f32[2,1,256], index: 2, kind: output, shape index: {}]  }
   0x1   :  { %9 = vsyncpa [#allocation3 + $0x1], 0  ;;  %s751_s9 = smov 0   ;;  %s753_s10 = smov 0  }
   0x2   :  { %s755_s11 = smov 0   ;;  %s757_s12 = smov 0  }
   0x3   :  { %s759_s13 = smov 0   ;;  %s761_s14 = smov 0  }
   0x4 LB: > { %s557_s15 = sadd.s32 4294967295, %s733_s14   ;;  %s558_s16 = sadd.s32 4294967294, %s733_s14   ;;  %s733_s14 = sphi %s761_s14, %s15_s14   ;;  %s729_s13 = sphi %s759_s13, %s952_s13   ;;  %s725_s12 = sphi %s757_s12, %s951_s12   ;;  %s721_s11 = sphi %s755_s11, %s950_s11   ;;  %s717_s10 = sphi %s753_s10, %s949_s10   ;;  %s713_s9 = sphi %s751_s9, %s948_s9  }
   0x5   : > { %s27_s17 = sadd.s32 1, %s729_s13  ;;  %s92_s18 = sadd.s32 1, %s721_s11 }
   0x6   : > { %p29_p0 = scmp.ge.s32.totalorder %s27_s17, 2  ;;  %p102_p1 = scmp.ne.s32.totalorder %s721_s11, %s717_s10 }
   0x7   : > { %p103_p2 = scmp.eq.s32.totalorder %s557_s15, 1  ;;  %p108_p3 = scmp.ne.s32.totalorder %s717_s10, %s713_s9 }
   0x8   : > { %s954_s17 = smov (%p29_p0, %s27_s17), 0  ;;  %p109_p5 = scmp.eq.s32.totalorder %s558_s16, 1 }
   0x9   : > { %p791_p4 = por %p103_p2, %p102_p1  ;;  %s87_s20 = ssub.s32 %s729_s13, %s954_s17 }
   0xa   : > { %p561_p6 = scmp.ge.s32.totalorder %s733_s14, 1  ;;  %p90_p7 = scmp.eq.s32.totalorder %s87_s20, 0 }
   0xb   : > { %p798_p8 = por %p109_p5, %p108_p3  ;;  %p152_p9 = scmp.lt.s32.totalorder %s733_s14, 3 }
   0xc   : > { %s804_s22 = scalar_select %p90_p7, %s721_s11, %s92_s18  }
   0xd   : > { %p153_p10 = pnand %p561_p6, %p152_p9 }
   0xe   : > { %p187_p11 = scmp.lt.s32.totalorder (!%p153_p10), %s725_s12, 1  ;;  %s183_s4 = sand.u32 (!%p153_p10), 1, %s717_s10  }
   0xf   : > { %156 = sbr.rel (%p153_p10) target bundleno = 125 (0x7d), region = 28  ;;  %s562_s5 = sshll.u32 (!%p153_p10), %s183_s4, 1 }
  0x10   : > { %s567_s6 = sshll.u32 (!%p153_p10), %s725_s12, 1  ;;  %s185_s16 = scalar_lea.vmem (!%p153_p10), [#allocation2], %s562_s5 }
  0x11   : > { %s462_s15 = scalar_lea.hbm (!%p153_p10), %s941_s2, %s567_s6  ;;  %s450_s20 = scalar_lea.sflag (!%p153_p10), [#allocation3], %s183_s4 }
  0x12   : > { %s466_s18 = sshll.u32 (!%p153_p10), %s462_s15, 4  ;;  %s467_s18 = int_to_ptr.hbm [resolvable:$true] %s466_s18 }
  0x14   : > { %s188_s23 = scalar_select %p187_p11, %s725_s12, 1  ;;  %vm247_vm0 = vcmask 1040384  }
  0x15   : > { %s464_s12 = sshll.u32 %s185_s16, 4  ;;  %s465_s12 = int_to_ptr.vmem [resolvable:$true] %s464_s12 }
  0x16   : > { %s570_s24 = sshll.u32 %s188_s23, 4  ;;  %s565_s28 = sshll.u32 %s188_s23, 1 }
  0x17   : > { %s194_s27 = scalar_lea.vmem %s939_s0, %s570_s24  ;;  %s203_s3 = scalar_lea.vmem %s940_s1, %s565_s28 }
  0x18   : > { %v811_v0 = vld [vmem:[%s194_s27] sm:$0x1f]  ;;  %v207_v1 = vld [vmem:[%s194_s27 + $0x8] sm:$0x1f]  ;;  %s669_s23 = sshra.s32 %s467_s18, 4  ;;  %s675_s27 = scalar_lea.hbm %s941_s2, 4  ;;  %s670_s23 = int_to_ptr.hbm [resolvable:$true] %s669_s23 }
  0x19   : > { %v211_v2 = vrot.slane %v811_v0, 1  ;;  %v217_v3 = vrot.slane %v811_v0, 2  ;;  %v212_v4 = vrot.slane %v207_v1, 1  ;;  %v218_v5 = vrot.slane %v207_v1, 2  ;;  %v822_v24 = vld [vmem:[%s203_s3] sm:$0x3]  ;;  %p676_p1 = scmp.lt.s32.totalorder %s670_s23, %s941_s2 }
  0x1a   : > { %v223_v7 = vrot.slane %v811_v0, 3  ;;  %v224_v9 = vrot.slane %v207_v1, 3  ;;  %v229_v11 = vrot.slane %v811_v0, 4  ;;  %v230_v13 = vrot.slane %v207_v1, 4  ;;  %s671_s24 = scalar_lea.hbm %s670_s23, 2 }
  0x1b   : > { %v215_v6 = vmax.f32 %v811_v0, %v211_v2  ;;  %v216_v8 = vmax.f32 %v207_v1, %v212_v4  ;;  %vm243_vm1 = vcmp.eq.s32.totalorder %v822_v24, 0  ;;  %vm278_vm2 = vcmp.eq.s32.totalorder %v822_v24, 1  ;;  %p672_p12 = scmp.ne.s32.totalorder %s670_s23, %s671_s24  ;;  %p677_p2 = scmp.lt.s32.totalorder %s675_s27, %s671_s24 }
  0x1c   : > { %vm312_vm3 = vcmp.eq.s32.totalorder %v822_v24, 2  ;;  %vm346_vm4 = vcmp.eq.s32.totalorder %v822_v24, 3  ;;  %vm380_vm10 = vcmp.eq.s32.totalorder %v822_v24, 4 }
  0x1d   : > { %v221_v10 = vmax.f32 %v215_v6, %v217_v3  ;;  %v222_v12 = vmax.f32 %v216_v8, %v218_v5  ;;  %p673_p13 = pnand %p672_p12, %p791_p4  ;;  %p678_p3 = por %p677_p2, %p676_p1 }
  0x1f   : > { %v227_v14 = vmax.f32 %v221_v10, %v223_v7  ;;  %v228_v15 = vmax.f32 %v222_v12, %v224_v9  ;;  %p674_p0 = pneg %p673_p13 }
  0x21   : > { %v233_v16 = vmax.f32 %v227_v14, %v229_v11  ;;  %v234_v17 = vmax.f32 %v228_v15, %v230_v13  ;;  %p679_p5 = pnand %p678_p3, %p674_p0 }
  0x23   : > { %v260_v18 = vrot.slane %v233_v16, 7  ;;  %v261_v19 = vrot.slane %v234_v17, 7  ;;  %v236_v21 = vsub.f32 %v207_v1, %v234_v17  ;;  %v235_v25 = vsub.f32 %v811_v0, %v233_v16 }
  0x24   : > { %v295_v27 = vrot.slane %v234_v17, 6  ;;  %v329_v28 = vrot.slane %v234_v17, 5  ;;  %v294_v30 = vrot.slane %v233_v16, 6  ;;  %v328_v32 = vrot.slane %v233_v16, 5 }
  0x25   : > { %v264_v20 = vsub.f32 %v811_v0, %v260_v18  ;;  %v265_v22 = vsub.f32 %v207_v1, %v261_v19  ;;  %v246_v29 = vrot.slane %v236_v21, 7  ;;  %v363_v35 = vrot.slane %v234_v17, 4 }
  0x26   : > { %v299_v31 = vsub.f32 %v207_v1, %v295_v27  ;;  %v827_v34 = vsub.f32 %v207_v1, %v329_v28  ;;  %v239_v37 = vmul.f32 1.442695, %v236_v21  ;;  %v298_v40 = vsub.f32 %v811_v0, %v294_v30 }
  0x27   : > { %v266_v23 = vmul.f32 1.442695, %v264_v20  ;;  %281 = vst [vmem:[#allocation1] sm:$0xff] %v264_v20  ;;  %v268_v26 = vmul.f32 1.442695, %v265_v22  ;;  %v248_v33 = vsel %vm247_vm0, %v235_v25, %v246_v29  ;;  %v332_v43 = vsub.f32 %v811_v0, %v328_v32 }
  0x28   : > { %282 = vst [vmem:[#allocation1 + $0x9] sm:$0xff] %v265_v22  ;;  %v250_v36 = vsel %vm243_vm1, %v248_v33, 0.0  ;;  %v302_v41 = vmul.f32 1.442695, %v299_v31  ;;  %v362_v45 = vrot.slane %v233_v16, 4  ;;  %v836_v46 = vsub.f32 %v207_v1, %v363_v35 }
  0x29   : > { %627 = vpow2.f32 %v266_v23  ;;  %v336_v47 = vmul.f32 1.442695, %v827_v34  ;;  %v237_v48 = vmul.f32 1.442695, %v235_v25  ;;  %v300_v49 = vmul.f32 1.442695, %v298_v40 }
  0x2a   : > { %629 = vpow2.f32 %v268_v26  ;;  %v334_v50 = vmul.f32 1.442695, %v332_v43  ;;  %v366_v51 = vsub.f32 %v811_v0, %v362_v45  ;;  %v370_v52 = vmul.f32 1.442695, %v836_v46 }
  0x2b   : > { %631 = vpow2.f32 %v239_v37 }
  0x2c   : > { %633 = vpow2.f32 %v302_v41  ;;  %v368_v57 = vmul.f32 1.442695, %v366_v51 }
  0x2d   : > { %635 = vpow2.f32 %v336_v47 }
  0x2e   : > { %637 = vpow2.f32 %v237_v48 }
  0x2f   : > { %v628_v38 = vpop.eup %627  ;;  %v284_v39 = vld [vmem:[#allocation1 + $0x1] ss:$9 sm:$0xff]  ;;  %639 = vpow2.f32 %v300_v49 }
  0x30   : > { %v630_v42 = vpop.eup %629  ;;  %287 = vst [vmem:[#allocation1] sm:$0xff] %v628_v38  ;;  %v286_v44 = vsel %vm278_vm2, %v284_v39, %v250_v36  ;;  %641 = vpow2.f32 %v334_v50  ;;  %v272_v58 = vrot.slane %v628_v38, 1 }
  0x31   : > { %288 = vst [vmem:[#allocation1 + $0x9] sm:$0xff] %v630_v42  ;;  %v273_v53 = vrot.slane %v630_v42, 1  ;;  %v841_v54 = vpop.eup %631  ;;  %643 = vpow2.f32 %v370_v52 }
  0x32   : > { %v634_v56 = vpop.eup %633  ;;  %645 = vpow2.f32 %v368_v57 }
  0x33   : > { %v277_v59 = vadd.f32 %v841_v54, %v273_v53  ;;  %v307_v60 = vrot.slane %v634_v56, 2  ;;  %v636_v61 = vpop.eup %635 }
  0x34   : > { %v846_v62 = vpop.eup %637  ;;  %v341_v4 = vrot.slane %v636_v61, 3 }
  0x35   : > { %v640_v63 = vpop.eup %639  ;;  %v276_v1 = vadd.f32 %v846_v62, %v272_v58  ;;  %v311_v3 = vadd.f32 %v307_v60, %v277_v59 }
  0x36   : > { %v642_v0 = vpop.eup %641  ;;  %v306_v2 = vrot.slane %v640_v63, 2 }
  0x37   : > { %v644_v5 = vpop.eup %643  ;;  %v340_v6 = vrot.slane %v642_v0, 3  ;;  %v345_v9 = vadd.f32 %v341_v4, %v311_v3 }
  0x38   : > { %v843_v55 = vld [vmem:[#allocation1 + $0x1] ss:$9 sm:$0xff]  ;;  %v310_v8 = vadd.f32 %v306_v2, %v276_v1  ;;  %v375_v10 = vrot.slane %v644_v5, 4  ;;  %v646_v12 = vpop.eup %645 }
  0x39   : > { %315 = vst [vmem:[#allocation1] sm:$0xff] %v298_v40  ;;  %v374_v14 = vrot.slane %v646_v12, 4 }
  0x3a   : > { %316 = vst [vmem:[#allocation1 + $0x9] sm:$0xff] %v299_v31  ;;  %v344_v13 = vadd.f32 %v340_v6, %v310_v8  ;;  %v379_v15 = vadd.f32 %v375_v10, %v345_v9  ;;  %v444_v6 = vlaneseq }
  0x3c   : > { %v378_v16 = vadd.f32 %v374_v14, %v344_v13  ;;  %647 = vrcp.f32 %v379_v15  ;;  %vm415_vm5 = vweird.f32 %v379_v15  ;;  %v421_v29 = vand.u32 2147483648, %v379_v15 }
  0x3d   : > { %v419_v32 = vand.u32 2147483647, %v379_v15  ;;  %vm446_vm14 = vcmp.lt.s32.totalorder %v444_v6, 256 }
  0x3e   : > { %649 = vrcp.f32 %v378_v16  ;;  %vm401_vm8 = vweird.f32 %v378_v16  ;;  %v407_v35 = vand.u32 2147483648, %v378_v16  ;;  %v422_v36 = vor.u32 1.1754944e-38, %v421_v29 }
  0x3f   : > { %651 = vlog2.f32 %v379_v15  ;;  %v405_v38 = vand.u32 2147483647, %v378_v16  ;;  %vm420_vm11 = vcmp.eq.f32.partialorder %v419_v32, 8.507059e+37 }
  0x40   : > { %653 = vlog2.f32 %v378_v16 }
  0x41   : > { %v318_v7 = vld [vmem:[#allocation1 + $0x2] ss:$9 sm:$0xff]  ;;  %vm406_vm13 = vcmp.eq.f32.partialorder %v405_v38, 8.507059e+37 }
  0x42   : > { %321 = vst [vmem:[#allocation1] sm:$0xff] %v640_v63  ;;  %v320_v11 = vsel %vm312_vm3, %v318_v7, %v286_v44  ;;  %v648_v18 = vpop.eup %647  ;;  %v408_v44 = vor.u32 1.1754944e-38, %v407_v35 }
  0x43   : > { %322 = vst [vmem:[#allocation1 + $0x9] sm:$0xff] %v634_v56  ;;  %v411_v20 = vmul.f32 %v648_v18, %v379_v15  ;;  %vm416_vm6 = vweird.f32 %v648_v18 }
  0x44   : > { %v650_v21 = vpop.eup %649  ;;  %vm857_vm7 = vmor %vm415_vm5, %vm416_vm6 }
  0x45   : > { %v397_v23 = vmul.f32 %v650_v21, %v378_v16  ;;  %v412_v25 = vsub.f32 1.0, %v411_v20  ;;  %vm402_vm9 = vweird.f32 %v650_v21  ;;  %v652_v49 = vpop.eup %651 }
  0x46   : > { %vm865_vm12 = vmor %vm401_vm8, %vm402_vm9  ;;  %v654_v56 = vpop.eup %653 }
  0x47   : > { %v398_v26 = vsub.f32 1.0, %v397_v23  ;;  %v413_v27 = vmul.f32 %v648_v18, %v412_v25 }
  0x49   : > { %v399_v30 = vmul.f32 %v650_v21, %v398_v26  ;;  %v414_v31 = vadd.f32 %v648_v18, %v413_v27 }
  0x4a   : > { %v324_v17 = vld [vmem:[#allocation1 + $0x2] ss:$9 sm:$0xff] }
  0x4b   : > { %349 = vst [vmem:[#allocation1] sm:$0xff] %v332_v43  ;;  %v400_v37 = vadd.f32 %v650_v21, %v399_v30  ;;  %v418_v39 = vsel %vm857_vm7, %v648_v18, %v414_v31 }
  0x4c   : > { %350 = vst [vmem:[#allocation1 + $0x9] sm:$0xff] %v827_v34  ;;  %v253_v34 = vrot.slane %v841_v54, 7  ;;  %v423_v45 = vsel %vm420_vm11, %v422_v36, %v418_v39  ;;  %v433_v54 = vmul.f32 0.6931472, %v652_v49 }
  0x4d   : > { %v404_v48 = vsel %vm865_vm12, %v650_v21, %v400_v37 }
  0x4e   : > { %v254_v42 = vsel %vm247_vm0, %v846_v62, %v253_v34  ;;  %v409_v53 = vsel %vm406_vm13, %v408_v44, %v404_v48  ;;  %v436_v1 = vrot.slane %v433_v54, 7 }
  0x4f   : > { %v256_v50 = vsel %vm243_vm1, %v254_v42, 0.0 }
  0x50   : > { %v292_v57 = vsel %vm278_vm2, %v843_v55, %v256_v50 }
  0x51   : > { %v326_v58 = vsel %vm312_vm3, %v324_v17, %v292_v57 }
  0x53   : > { %v352_v19 = vld [vmem:[#allocation1 + $0x3] ss:$9 sm:$0xff] }
  0x54   : > { %355 = vst [vmem:[#allocation1] sm:$0xff] %v642_v0  ;;  %v354_v22 = vsel %vm346_vm4, %v352_v19, %v320_v11  ;;  %v431_v0 = vmul.f32 0.6931472, %v654_v56 }
  0x55   : > { %356 = vst [vmem:[#allocation1 + $0x9] sm:$0xff] %v636_v61 }
  0x5c   : > { %v358_v28 = vld [vmem:[#allocation1 + $0x3] ss:$9 sm:$0xff] }
  0x5d   : > { %383 = vst [vmem:[#allocation1] sm:$0xff] %v366_v51  ;;  %v426_v51 = vrot.slane %v423_v45, 7  ;;  %v360_v61 = vsel %vm346_vm4, %v358_v28, %v326_v58 }
  0x5e   : > { %384 = vst [vmem:[#allocation1 + $0x9] sm:$0xff] %v836_v46  ;;  %v735_v46 = vmov 0.0  }
  0x5f   : > { %v257_v47 = vsel %vm243_vm1, -0.0125, %v735_v46  ;;  %v427_v60 = vsel %vm247_vm0, %v409_v53, %v426_v51 }
  0x60   : > { %v293_v52 = vsel %vm278_vm2, -0.0375, %v257_v47 }
  0x61   : > { %v327_v59 = vsel %vm312_vm3, -0.2, %v293_v52 }
  0x62   : > { %v361_v55 = vsel %vm346_vm4, -0.2, %v327_v59 }
  0x63   : > { %v395_v4 = vsel %vm380_vm10, -0.0375, %v361_v55 }
  0x65   : > { %v386_v41 = vld [vmem:[#allocation1 + $0x4] ss:$9 sm:$0xff] }
  0x66   : > { %389 = vst [vmem:[#allocation1] sm:$0xff] %v646_v12  ;;  %v388_v43 = vsel %vm380_vm10, %v386_v41, %v354_v22 }
  0x67   : > { %390 = vst [vmem:[#allocation1 + $0x9] sm:$0xff] %v644_v5  ;;  %v437_v5 = vsel %vm247_vm0, %v431_v0, %v436_v1 }
  0x68   : > { %v439_v8 = vsub.f32 %v388_v43, %v437_v5 }
  0x6e   : > { %v392_v62 = vld [vmem:[#allocation1 + $0x4] ss:$9 sm:$0xff] }
  0x6f   : > { %v394_v63 = vsel %vm380_vm10, %v392_v62, %v360_v61 }
  0x70   : > { %v429_v2 = vmul.f32 %v427_v60, %v394_v63 }
  0x72   : > { %v440_v3 = vsub.f32 1.0, %v429_v2 }
  0x74   : > { %v441_v7 = vmul.f32 %v440_v3, %v440_v3 }
  0x76   : > { %v442_v9 = vmul.f32 %v441_v7, %v395_v4 }
  0x78   : > { %v443_v10 = vmul.f32 %v442_v9, %v439_v8 }
  0x7a   : > { %448 = vst.msk [vmem:[%s185_s16] sm:$0x3] %vm446_vm14, %v443_v10 }
  0x7b   : > { %682 = shalt.err (!%p679_p5)
}
  0x7c   : > { %571 = dma.vmem_to_hbm [thread:$0]  (%p791_p4), %s465_s12, 32, %s467_s18, %s450_s20  }
  0x7d PF: > { %p577_p6 = scmp.ge.s32.totalorder %s733_s14, 2  ;;  %s478_s30 = sand.u32 1, %s713_s9  }
  0x7e   : > { %s479_s3 = scalar_lea.sflag [#allocation3], %s478_s30 }
  0x7f   : > { %p574_p7 = pnand %p577_p6, %p798_p8 }
  0x81   : > { %p575_p9 = pneg %p574_p7 }
  0x83   : > { %708 = dma.done.wait (%p575_p9), %s479_s3, 32  }
  0x84   : > { %710 = vsyncadd (%p575_p9), %s479_s3, 4294967264  ;;  %s15_s14 = sadd.s32 1, %s733_s14   ;;  %s948_s9 = smov %s717_s10 }
  0x85   : > { %p12_p10 = scmp.ge.s32.totalorder %s15_s14, 4   ;;  %s949_s10 = smov %s721_s11 }
  0x86   : > { %s950_s11 = smov %s804_s22  ;;  %s951_s12 = smov %s729_s13 }
  0x87   : > { %s952_s13 = smov %s954_s17  ;;  %14 = sbr.rel (!%p12_p10) target bundleno = 4 (0x4), region = 74 }
  0x8c   :  { %485 = vsyncpa [#allocation3], 1 }
  0x8d   :  { %487 = vsyncpa [#allocation3 + $0x1], 1 }

</bundles_post_ra>
